<compile_context>
chip_gen: v7x
topology: tpu7x:2x2x1
jax: 0.10.0
libtpu: 0.0.40
codegen_flags: <defaults>
</compile_context>

<pallas_src>
import numpy as np
import jax
import jax.numpy as jnp
from jax.experimental import pallas as pl
from jax.experimental.pallas import tpu as pltpu

INTERP = 178  # F.interpolate(out, 178, mode='bilinear')


# ---------------------------------------------------------------------------
# Fused kernel: conv1+ReLU+maxpool+conv2 -> bilinear 178x178 (bf16) -> GAP col sums
# Processes BN batch items per grid step.
# ---------------------------------------------------------------------------
def _fused_kernel(xp_ref, w1_ref, b1_ref, w2f_ref, b2_ref, rwt_ref, rh_ref, c_ref,
                  img_ref, csum_ref, y2bf_ref, tmp_ref):
    BN = xp_ref.shape[0]
    Lp = xp_ref.shape[2]
    L1 = Lp - 2              # conv1 (k=3, pad=2) output length
    K2 = rwt_ref.shape[0]    # 2 * L2 (lane-strided conv2 output width)
    L2 = K2 // 2
    P = L2 - 2               # pooled length
    W = K2 + 4               # strided pooled-and-padded buffer width

    w1 = w1_ref[...]         # (8, 3)
    b1 = b1_ref[...]         # (8, 1)
    w2f = w2f_ref[...]       # (16, 24) tap-major flattened conv2 weight
    b2 = b2_ref[...]         # (16, 1)
    zl = jnp.zeros((8, 4), jnp.float32)
    zr = jnp.zeros((8, 5), jnp.float32)

    # ---- stage 1: conv1 + ReLU + max_pool1d(2) + conv2, per batch item ----
    def conv_stage(b, carry):
        row = xp_ref[b]                                      # (1, Lp) zero-padded signal
        # conv1 (1->8, k=3) as broadcast FMAs on the VPU (exact f32) + ReLU
        y1 = b1 + w1[:, 0:1] * row[:, 0:L1]
        y1 = y1 + w1[:, 1:2] * row[:, 1:1 + L1]
        y1 = y1 + w1[:, 2:3] * row[:, 2:2 + L1]
        y1 = jnp.maximum(y1, 0.0)                            # (8, L1)
        # max_pool1d(2): shift + max.  pooled[j] lands at even lane 2j of a buffer that
        # is zero outside the valid range -> the zeros double as conv2's zero padding.
        y1b = jnp.concatenate([zl, y1[:, :2 * P], zr], axis=1)   # (8, W + 1)
        mp = jnp.maximum(y1b[:, :W], y1b[:, 1:W + 1])            # (8, W)
        # conv2 (8->16, k=3) on the 2x-wide strided buffer: single dot with the 3 taps
        # stacked along the contraction dim.  Valid outputs live at even lanes; the junk
        # at odd lanes is killed by the zero rows of the strided Rw^T downstream.
        m3 = jnp.concatenate([mp[:, 0:K2], mp[:, 2:2 + K2], mp[:, 4:4 + K2]], axis=0)
        y2w = b2 + jnp.dot(w2f, m3, preferred_element_type=jnp.float32)   # (16, K2)
        off = pl.multiple_of(b * 16, 16)
        y2bf_ref[pl.ds(off, 16), :] = y2w.astype(jnp.bfloat16)
        return carry

    jax.lax.fori_loop(0, BN, conv_stage, 0)

    # ---- stage 2: batch-packed first interpolation matmul (lane-dense 178) ----
    tmp = jnp.dot(y2bf_ref[...], rwt_ref[...],
                  preferred_element_type=jnp.float32)        # (BN*16, 178) f32
    tmp_ref[...] = tmp

    # ---- stage 3: GAP column sums for the whole block via block-diag colsum(Rh) ----
    csum_ref[0] = jnp.dot(c_ref[...], tmp, precision=jax.lax.Precision.HIGHEST,
                          preferred_element_type=jnp.float32)   # (BN, 178)

    # ---- stage 4: second interpolation matmul + bf16 image writeback ----
    rh = rh_ref[...]                                         # (178, 16) bf16

    def interp_stage(b, carry):
        off = pl.multiple_of(b * 16, 16)
        tmp_b = tmp_ref[pl.ds(off, 16), :].astype(jnp.bfloat16)         # (16, 178)
        out_b = jnp.dot(rh, tmp_b, preferred_element_type=jnp.float32)  # (178, 178)
        img_ref[b] = out_b.astype(jnp.bfloat16)
        return carry

    jax.lax.fori_loop(0, BN, interp_stage, 0)


def fused_signal_to_image(xp3, w1m, b1c, w2f, b2c, rwt_s, rh_bf, cmat, *, bn):
    Np, _, Lp = xp3.shape
    K2 = rwt_s.shape[0]
    assert Np % bn == 0
    grid_len = Np // bn

    flops_per_item = int(2 * 16 * K2 * INTERP + 2 * INTERP * 16 * INTERP
                         + 2 * 8 * 3 * (Lp - 2) + 2 * 16 * 24 * K2 + 2 * 16 * INTERP)
    bytes_accessed = int(Np * (Lp * 4 + INTERP * INTERP * 2 + INTERP * 4)
                         + (K2 * INTERP + INTERP * 16) * 2
                         + (bn * bn * 16 + 8 * 3 + 8 + 16 * 24 + 16) * 4)

    return pl.pallas_call(
        _fused_kernel,
        out_shape=(
            jax.ShapeDtypeStruct((Np, INTERP, INTERP), jnp.bfloat16),   # image (bf16)
            jax.ShapeDtypeStruct((grid_len, bn, INTERP), jnp.float32),  # GAP column sums
        ),
        grid=(grid_len,),
        in_specs=[
            pl.BlockSpec((bn, 1, Lp), lambda g: (g, 0, 0)),    # padded signals
            pl.BlockSpec((8, 3), lambda g: (0, 0)),            # conv1 weight
            pl.BlockSpec((8, 1), lambda g: (0, 0)),            # conv1 bias
            pl.BlockSpec((16, 24), lambda g: (0, 0)),          # conv2 weight (tap-major)
            pl.BlockSpec((16, 1), lambda g: (0, 0)),           # conv2 bias
            pl.BlockSpec((K2, INTERP), lambda g: (0, 0)),      # strided Rw^T (bf16)
            pl.BlockSpec((INTERP, 16), lambda g: (0, 0)),      # Rh (bf16)
            pl.BlockSpec((bn, bn * 16), lambda g: (0, 0)),     # block-diag colsum(Rh)
        ],
        out_specs=(
            pl.BlockSpec((bn, INTERP, INTERP), lambda g: (g, 0, 0)),
            pl.BlockSpec((1, bn, INTERP), lambda g: (g, 0, 0)),
        ),
        scratch_shapes=[
            pltpu.VMEM((bn * 16, K2), jnp.bfloat16),      # strided y2 (batch-packed)
            pltpu.VMEM((bn * 16, INTERP), jnp.float32),   # first-interp intermediate
        ],
        compiler_params=pltpu.CompilerParams(
            dimension_semantics=("parallel",)),
        cost_estimate=pl.CostEstimate(flops=Np * flops_per_item,
                                      transcendentals=0,
                                      bytes_accessed=bytes_accessed),
    )(xp3, w1m, b1c, w2f, b2c, rwt_s, rh_bf, cmat)


# ---------------------------------------------------------------------------
# Constant matrices
# ---------------------------------------------------------------------------
def torch_bilinear_matrix(in_size, out_size):
    """Exact PyTorch bilinear (align_corners=False) weights as a dense (out,in) matrix."""
    scale = in_size / out_size
    i = np.arange(out_size, dtype=np.float64)
    src = np.maximum(scale * (i + 0.5) - 0.5, 0.0)
    i0 = np.minimum(np.floor(src).astype(np.int64), in_size - 1)
    frac = src - i0
    i1 = np.minimum(i0 + 1, in_size - 1)
    M = np.zeros((out_size, in_size), np.float64)
    M[np.arange(out_size), i0] += (1.0 - frac)
    M[np.arange(out_size), i1] += frac
    return M.astype(np.float32)


# ---------------------------------------------------------------------------
# Full forward
# ---------------------------------------------------------------------------
def cnn_two_layers_forward(x, params, *, batch_block=None):
    N, Cin, L = x.shape
    assert Cin == 1
    L1 = L + 2                 # conv1 (k=3, pad=2) output length
    P = L1 // 2                # max_pool1d(2) floor behaviour (matches torch)
    L2 = P + 2                 # conv2 (k=3, pad=2) output length
    K2 = 2 * L2

    # batch block: target 16 (fills the 256-row MXU on v6e/v7x) while keeping ~>=4 grid
    # steps so both v7x TensorCores get work and the img writeback software-pipelines.
    if batch_block is None:
        batch_block = max(1, min(16, N // 4)) if N >= 4 else 1
    bn = batch_block
    pad_n = (-N) % bn
    Np = N + pad_n

    # zero-pad the signal (conv1 padding) and the batch to a multiple of bn
    xp3 = jnp.pad(x.astype(jnp.float32), ((0, pad_n), (0, 0), (2, 2)))   # (Np, 1, L+4)

    w1m = params["conv1_w"][:, 0, :].astype(jnp.float32)                 # (8, 3)
    b1c = params["conv1_b"].astype(jnp.float32)[:, None]                 # (8, 1)
    # conv2 weight flattened tap-major: w2f[o, k*8 + c] = conv2_w[o, c, k]
    w2f = jnp.transpose(params["conv2_w"].astype(jnp.float32),
                        (0, 2, 1)).reshape(16, 24)
    b2c = params["conv2_b"].astype(jnp.float32)[:, None]                 # (16, 1)

    rh_np = torch_bilinear_matrix(16, INTERP)                            # (178, 16)
    rw_np = torch_bilinear_matrix(L2, INTERP)                            # (178, L2)
    # strided Rw^T: row 2j = Rw^T[j], odd rows zero (folds the even-lane pool compaction)
    rwt_s_np = np.zeros((K2, INTERP), np.float32)
    rwt_s_np[0::2, :] = rw_np.T
    rwt_s = jnp.asarray(rwt_s_np).astype(jnp.bfloat16)
    rh_bf = jnp.asarray(rh_np).astype(jnp.bfloat16)
    # block-diagonal colsum(Rh) constant -> dense (bn, 178) GAP column sums in-kernel
    colsum = rh_np.sum(axis=0).astype(np.float32)                        # (16,)
    cmat_np = np.zeros((bn, bn * 16), np.float32)
    for b in range(bn):
        cmat_np[b, b * 16:(b + 1) * 16] = colsum
    cmat = jnp.asarray(cmat_np)

    img_bf, csum_g = fused_signal_to_image(xp3, w1m, b1c, w2f, b2c,
                                           rwt_s, rh_bf, cmat, bn=bn)
    img = img_bf[:N]                                                     # (N,178,178) bf16
    csum = csum_g.reshape(Np, INTERP)[:N]                                # (N, 178) f32

    # torch: out = cat((img, img, img), 1) -> base_model(out)
    # The 3 channels are identical, so the concatenation is never materialized.
    # TODO(synk): base_model is an arbitrary torchvision backbone passed to __init__
    # (alexnet/vgg/resnet/densenet) and cannot be reproduced here; stand-in head =
    # global average pool (fused into the kernel as column sums) + the replaced final
    # Linear(-> num_classes).
    feats_mean = jnp.sum(csum, axis=-1) / float(INTERP * INTERP)         # (N,)
    feats3 = jnp.broadcast_to(feats_mean[:, None], (N, 3))               # (N, 3)
    logits = feats3 @ params["fc_w"] + params["fc_b"]                    # (N, num_classes)
    return logits, img


# ---------------------------------------------------------------------------
# Pure-JAX high-precision reference (sanity checks)
# ---------------------------------------------------------------------------
def _reference_conv_stack(x, w1, b1, w2, b2):
    hp = jax.lax.Precision.HIGHEST
    dn = jax.lax.conv_dimension_numbers(x.shape, w1.shape, ("NCH", "OIH", "NCH"))
    y = jax.lax.conv_general_dilated(x, w1, (1,), ((2, 2),),
                                     dimension_numbers=dn, precision=hp)
    y = jax.nn.relu(y + b1[None, :, None])
    y = jax.lax.reduce_window(y, -jnp.inf, jax.lax.max, (1, 1, 2), (1, 1, 2), "VALID")
    dn2 = jax.lax.conv_dimension_numbers(y.shape, w2.shape, ("NCH", "OIH", "NCH"))
    y = jax.lax.conv_general_dilated(y, w2, (1,), ((2, 2),),
                                     dimension_numbers=dn2, precision=hp)
    return y + b2[None, :, None]


if __name__ == "__main__":
    N, L, num_classes = 4, 16, 5
    key = jax.random.PRNGKey(0)
    k1, k2, k3, k4, k5, k6, k7 = jax.random.split(key, 7)
    params = {
        "conv1_w": jax.random.normal(k1, (8, 1, 3), jnp.float32) * 0.3,
        "conv1_b": jax.random.normal(k2, (8,), jnp.float32) * 0.1,
        "conv2_w": jax.random.normal(k3, (16, 8, 3), jnp.float32) * 0.2,
        "conv2_b": jax.random.normal(k4, (16,), jnp.float32) * 0.1,
        "fc_w": jax.random.normal(k5, (3, num_classes), jnp.float32) * 0.5,
        "fc_b": jax.random.normal(k6, (num_classes,), jnp.float32) * 0.1,
    }
    x = jax.random.normal(k7, (N, 1, L), jnp.float32)

    logits, img = cnn_two_layers_forward(x, params, batch_block=2)
    jax.block_until_ready((logits, img))

    # --- reference: exact conv stack + full-precision bilinear interpolation ---
    y2_ref = _reference_conv_stack(x, params["conv1_w"], params["conv1_b"],
                                   params["conv2_w"], params["conv2_b"])
    L2 = y2_ref.shape[2]
    rh = jnp.asarray(torch_bilinear_matrix(16, INTERP))
    rw = jnp.asarray(torch_bilinear_matrix(L2, INTERP))
    img_ref = jnp.einsum("hp,npq,wq->nhw", rh, y2_ref, rw,
                         precision=jax.lax.Precision.HIGHEST)

    # kernel img is bf16 with bf16-multiply MXU interp -> ~1e-2 level tolerance
    np.testing.assert_allclose(np.asarray(img.astype(jnp.float32)),
                               np.asarray(img_ref), rtol=3e-2, atol=3e-2)

    # --- stand-in GAP + Linear head ---
    feats_ref = jnp.mean(img_ref, axis=(1, 2))
    logits_ref = (jnp.broadcast_to(feats_ref[:, None], (N, 3)) @ params["fc_w"]
                  + params["fc_b"])
    np.testing.assert_allclose(np.asarray(logits), np.asarray(logits_ref),
                               rtol=3e-2, atol=3e-2)

    assert logits.shape == (N, num_classes) and bool(jnp.all(jnp.isfinite(logits)))
    assert img.shape == (N, INTERP, INTERP)
    print("KERNEL_OK")
</pallas_src>

<mosaic_0001>
module attributes {stable_mosaic.version = 11 : i64} {
  func.func @_fused_kernel(%arg0: i32, %arg1: memref<2x1x20xf32, #tpu.memory_space<vmem>>, %arg2: memref<8x3xf32, #tpu.memory_space<vmem>>, %arg3: memref<8x1xf32, #tpu.memory_space<vmem>>, %arg4: memref<16x24xf32, #tpu.memory_space<vmem>>, %arg5: memref<16x1xf32, #tpu.memory_space<vmem>>, %arg6: memref<22x178xbf16, #tpu.memory_space<vmem>>, %arg7: memref<178x16xbf16, #tpu.memory_space<vmem>>, %arg8: memref<2x32xf32, #tpu.memory_space<vmem>>, %arg9: memref<2x178x178xbf16, #tpu.memory_space<vmem>>, %arg10: memref<1x2x178xf32, #tpu.memory_space<vmem>>, %arg11: memref<32x22xbf16, #tpu.memory_space<vmem>>, %arg12: memref<32x178xf32, #tpu.memory_space<vmem>>) attributes {dimension_semantics = [#tpu.dimension_semantics<parallel>], iteration_bounds = array<i64: 2>, scalar_prefetch = 0 : i64, scratch_operands = 2 : i64, tpu.core_type = #tpu.core_type<tc>, window_params = [{transform_indices = @transform_0, window_bounds = array<i64: 2, 1, 20>}, {pipeline_mode = #tpu.pipeline_mode<synchronous>, transform_indices = @transform_1, window_bounds = array<i64: 8, 3>}, {pipeline_mode = #tpu.pipeline_mode<synchronous>, transform_indices = @transform_2, window_bounds = array<i64: 8, 1>}, {pipeline_mode = #tpu.pipeline_mode<synchronous>, transform_indices = @transform_3, window_bounds = array<i64: 16, 24>}, {pipeline_mode = #tpu.pipeline_mode<synchronous>, transform_indices = @transform_4, window_bounds = array<i64: 16, 1>}, {pipeline_mode = #tpu.pipeline_mode<synchronous>, transform_indices = @transform_5, window_bounds = array<i64: 22, 178>}, {pipeline_mode = #tpu.pipeline_mode<synchronous>, transform_indices = @transform_6, window_bounds = array<i64: 178, 16>}, {pipeline_mode = #tpu.pipeline_mode<synchronous>, transform_indices = @transform_7, window_bounds = array<i64: 2, 32>}, {transform_indices = @transform_8, window_bounds = array<i64: 2, 178, 178>}, {transform_indices = @transform_9, window_bounds = array<i64: 1, 2, 178>}]} {
    %c0 = arith.constant 0 : index
    %c0_0 = arith.constant 0 : index
    %0 = vector.load %arg2[%c0, %c0_0] : memref<8x3xf32, #tpu.memory_space<vmem>>, vector<8x3xf32>
    %c0_1 = arith.constant 0 : index
    %c0_2 = arith.constant 0 : index
    %1 = vector.load %arg3[%c0_1, %c0_2] : memref<8x1xf32, #tpu.memory_space<vmem>>, vector<8x1xf32>
    %c0_3 = arith.constant 0 : index
    %c0_4 = arith.constant 0 : index
    %2 = vector.load %arg4[%c0_3, %c0_4] : memref<16x24xf32, #tpu.memory_space<vmem>>, vector<16x24xf32>
    %c0_5 = arith.constant 0 : index
    %c0_6 = arith.constant 0 : index
    %3 = vector.load %arg5[%c0_5, %c0_6] : memref<16x1xf32, #tpu.memory_space<vmem>>, vector<16x1xf32>
    %cst = arith.constant 0.000000e+00 : f32
    %4 = vector.broadcast %cst : f32 to vector<8x4xf32>
    %cst_7 = arith.constant 0.000000e+00 : f32
    %5 = vector.broadcast %cst_7 : f32 to vector<8x5xf32>
    %c0_i32 = arith.constant 0 : i32
    %c2_i32 = arith.constant 2 : i32
    %6 = arith.addi %c0_i32, %c2_i32 : i32
    %c1_i32 = arith.constant 1 : i32
    scf.for %arg13 = %c0_i32 to %6 step %c1_i32  : i32 {
      %18 = arith.index_cast %arg13 : i32 to index
      %c0_28 = arith.constant 0 : index
      %c0_29 = arith.constant 0 : index
      %19 = vector.load %arg1[%18, %c0_28, %c0_29] : memref<2x1x20xf32, #tpu.memory_space<vmem>>, vector<1x1x20xf32>
      %20 = vector.shape_cast %19 : vector<1x1x20xf32> to vector<1x20xf32>
      %21 = vector.extract_strided_slice %0 {offsets = [0, 0], sizes = [8, 1], strides = [1, 1]} : vector<8x3xf32> to vector<8x1xf32>
      %22 = vector.extract_strided_slice %20 {offsets = [0, 0], sizes = [1, 18], strides = [1, 1]} : vector<1x20xf32> to vector<1x18xf32>
      %23 = vector.broadcast %21 : vector<8x1xf32> to vector<8x18xf32>
      %24 = vector.broadcast %22 : vector<1x18xf32> to vector<8x18xf32>
      %25 = arith.mulf %23, %24 : vector<8x18xf32>
      %26 = vector.broadcast %1 : vector<8x1xf32> to vector<8x18xf32>
      %27 = arith.addf %26, %25 : vector<8x18xf32>
      %28 = vector.extract_strided_slice %0 {offsets = [0, 1], sizes = [8, 1], strides = [1, 1]} : vector<8x3xf32> to vector<8x1xf32>
      %29 = vector.extract_strided_slice %20 {offsets = [0, 1], sizes = [1, 18], strides = [1, 1]} : vector<1x20xf32> to vector<1x18xf32>
      %30 = vector.broadcast %28 : vector<8x1xf32> to vector<8x18xf32>
      %31 = vector.broadcast %29 : vector<1x18xf32> to vector<8x18xf32>
      %32 = arith.mulf %30, %31 : vector<8x18xf32>
      %33 = arith.addf %27, %32 : vector<8x18xf32>
      %34 = vector.extract_strided_slice %0 {offsets = [0, 2], sizes = [8, 1], strides = [1, 1]} : vector<8x3xf32> to vector<8x1xf32>
      %35 = vector.extract_strided_slice %20 {offsets = [0, 2], sizes = [1, 18], strides = [1, 1]} : vector<1x20xf32> to vector<1x18xf32>
      %36 = vector.broadcast %34 : vector<8x1xf32> to vector<8x18xf32>
      %37 = vector.broadcast %35 : vector<1x18xf32> to vector<8x18xf32>
      %38 = arith.mulf %36, %37 : vector<8x18xf32>
      %39 = arith.addf %33, %38 : vector<8x18xf32>
      %cst_30 = arith.constant 0.000000e+00 : f32
      %40 = vector.broadcast %cst_30 : f32 to vector<8x18xf32>
      %41 = arith.maximumf %39, %40 : vector<8x18xf32>
      %42 = tpu.concatenate %4, %41, %5 in 1 : vector<8x4xf32>, vector<8x18xf32>, vector<8x5xf32> -> vector<8x27xf32>
      %43 = vector.extract_strided_slice %42 {offsets = [0, 0], sizes = [8, 26], strides = [1, 1]} : vector<8x27xf32> to vector<8x26xf32>
      %44 = vector.extract_strided_slice %42 {offsets = [0, 1], sizes = [8, 26], strides = [1, 1]} : vector<8x27xf32> to vector<8x26xf32>
      %45 = arith.maximumf %43, %44 : vector<8x26xf32>
      %46 = vector.extract_strided_slice %45 {offsets = [0, 0], sizes = [8, 22], strides = [1, 1]} : vector<8x26xf32> to vector<8x22xf32>
      %47 = vector.extract_strided_slice %45 {offsets = [0, 2], sizes = [8, 22], strides = [1, 1]} : vector<8x26xf32> to vector<8x22xf32>
      %48 = vector.extract_strided_slice %45 {offsets = [0, 4], sizes = [8, 22], strides = [1, 1]} : vector<8x26xf32> to vector<8x22xf32>
      %49 = tpu.concatenate %46, %47, %48 in 0 : vector<8x22xf32>, vector<8x22xf32>, vector<8x22xf32> -> vector<24x22xf32>
      %cst_31 = arith.constant dense<0.000000e+00> : vector<16x22xf32>
      %50 = tpu.matmul %2, %49, %cst_31 {dimension_numbers = #tpu.dot_dimension_numbers<[1], [0], [0], [1], [0, 0, 1, 1], [], []>} : vector<16x24xf32>, vector<24x22xf32>, vector<16x22xf32> -> vector<16x22xf32>
      %51 = vector.broadcast %3 : vector<16x1xf32> to vector<16x22xf32>
      %52 = arith.addf %51, %50 : vector<16x22xf32>
      %c16_i32 = arith.constant 16 : i32
      %53 = arith.muli %arg13, %c16_i32 : i32
      %54 = tpu.assume_multiple %53, 16 : i32
      %55 = arith.truncf %52 : vector<16x22xf32> to vector<16x22xbf16>
      %56 = arith.index_cast %54 : i32 to index
      %c0_32 = arith.constant 0 : index
      %57 = vector.load %arg11[%56, %c0_32] : memref<32x22xbf16, #tpu.memory_space<vmem>>, vector<16x22xbf16>
      tpu.vector_store %arg11[%56, %c0_32], %55 {strides = array<i32>} : memref<32x22xbf16, #tpu.memory_space<vmem>>, vector<16x22xbf16>,
    }
    %c2_i32_8 = arith.constant 2 : i32
    %c0_9 = arith.constant 0 : index
    %c0_10 = arith.constant 0 : index
    %7 = vector.load %arg11[%c0_9, %c0_10] : memref<32x22xbf16, #tpu.memory_space<vmem>>, vector<32x22xbf16>
    %c0_11 = arith.constant 0 : index
    %c0_12 = arith.constant 0 : index
    %8 = vector.load %arg6[%c0_11, %c0_12] : memref<22x178xbf16, #tpu.memory_space<vmem>>, vector<22x178xbf16>
    %cst_13 = arith.constant dense<0.000000e+00> : vector<32x178xf32>
    %9 = tpu.matmul %7, %8, %cst_13 {dimension_numbers = #tpu.dot_dimension_numbers<[1], [0], [0], [1], [0, 0, 1, 1], [], []>} : vector<32x22xbf16>, vector<22x178xbf16>, vector<32x178xf32> -> vector<32x178xf32>
    %c0_14 = arith.constant 0 : index
    %c0_15 = arith.constant 0 : index
    %10 = vector.load %arg12[%c0_14, %c0_15] : memref<32x178xf32, #tpu.memory_space<vmem>>, vector<32x178xf32>
    tpu.vector_store %arg12[%c0_14, %c0_15], %9 {strides = array<i32>} : memref<32x178xf32, #tpu.memory_space<vmem>>, vector<32x178xf32>,
    %c0_16 = arith.constant 0 : index
    %c0_17 = arith.constant 0 : index
    %11 = vector.load %arg8[%c0_16, %c0_17] : memref<2x32xf32, #tpu.memory_space<vmem>>, vector<2x32xf32>
    %cst_18 = arith.constant dense<0.000000e+00> : vector<2x178xf32>
    %12 = tpu.matmul %11, %9, %cst_18 {dimension_numbers = #tpu.dot_dimension_numbers<[1], [0], [0], [1], [0, 0, 1, 1], [], []>, precision = #tpu.contract_precision<fp32>} : vector<2x32xf32>, vector<32x178xf32>, vector<2x178xf32> -> vector<2x178xf32>
    %c0_19 = arith.constant 0 : index
    %c0_20 = arith.constant 0 : index
    %c0_21 = arith.constant 0 : index
    %13 = vector.load %arg10[%c0_19, %c0_20, %c0_21] : memref<1x2x178xf32, #tpu.memory_space<vmem>>, vector<1x2x178xf32>
    %14 = vector.shape_cast %13 : vector<1x2x178xf32> to vector<2x178xf32>
    %15 = vector.shape_cast %12 : vector<2x178xf32> to vector<1x2x178xf32>
    tpu.vector_store %arg10[%c0_19, %c0_20, %c0_21], %15 {strides = array<i32>} : memref<1x2x178xf32, #tpu.memory_space<vmem>>, vector<1x2x178xf32>,
    %c0_22 = arith.constant 0 : index
    %c0_23 = arith.constant 0 : index
    %16 = vector.load %arg7[%c0_22, %c0_23] : memref<178x16xbf16, #tpu.memory_space<vmem>>, vector<178x16xbf16>
    %c0_i32_24 = arith.constant 0 : i32
    %c2_i32_25 = arith.constant 2 : i32
    %17 = arith.addi %c0_i32_24, %c2_i32_25 : i32
    %c1_i32_26 = arith.constant 1 : i32
    scf.for %arg13 = %c0_i32_24 to %17 step %c1_i32_26  : i32 {
      %c16_i32 = arith.constant 16 : i32
      %18 = arith.muli %arg13, %c16_i32 : i32
      %19 = tpu.assume_multiple %18, 16 : i32
      %20 = arith.index_cast %19 : i32 to index
      %c0_28 = arith.constant 0 : index
      %21 = vector.load %arg12[%20, %c0_28] : memref<32x178xf32, #tpu.memory_space<vmem>>, vector<16x178xf32>
      %22 = arith.truncf %21 : vector<16x178xf32> to vector<16x178xbf16>
      %cst_29 = arith.constant dense<0.000000e+00> : vector<178x178xf32>
      %23 = tpu.matmul %16, %22, %cst_29 {dimension_numbers = #tpu.dot_dimension_numbers<[1], [0], [0], [1], [0, 0, 1, 1], [], []>} : vector<178x16xbf16>, vector<16x178xbf16>, vector<178x178xf32> -> vector<178x178xf32>
      %24 = arith.truncf %23 : vector<178x178xf32> to vector<178x178xbf16>
      %25 = arith.index_cast %arg13 : i32 to index
      %c0_30 = arith.constant 0 : index
      %c0_31 = arith.constant 0 : index
      %26 = vector.load %arg9[%25, %c0_30, %c0_31] : memref<2x178x178xbf16, #tpu.memory_space<vmem>>, vector<1x178x178xbf16>
      %27 = vector.shape_cast %26 : vector<1x178x178xbf16> to vector<178x178xbf16>
      %28 = vector.shape_cast %24 : vector<178x178xbf16> to vector<1x178x178xbf16>
      tpu.vector_store %arg9[%25, %c0_30, %c0_31], %28 {strides = array<i32>} : memref<2x178x178xbf16, #tpu.memory_space<vmem>>, vector<1x178x178xbf16>,
    }
    %c2_i32_27 = arith.constant 2 : i32
    return
  }
  func.func @transform_0(%arg0: i32) -> (i32, i32, i32) {
    %c0_i32 = arith.constant 0 : i32
    %c0_i32_0 = arith.constant 0 : i32
    %c0_i32_1 = arith.constant 0 : i32
    return %arg0, %c0_i32, %c0_i32_0 : i32, i32, i32
  }
  func.func @transform_1(%arg0: i32) -> (i32, i32) {
    %c0_i32 = arith.constant 0 : i32
    %c0_i32_0 = arith.constant 0 : i32
    %c0_i32_1 = arith.constant 0 : i32
    return %c0_i32, %c0_i32_0 : i32, i32
  }
  func.func @transform_2(%arg0: i32) -> (i32, i32) {
    %c0_i32 = arith.constant 0 : i32
    %c0_i32_0 = arith.constant 0 : i32
    %c0_i32_1 = arith.constant 0 : i32
    return %c0_i32, %c0_i32_0 : i32, i32
  }
  func.func @transform_3(%arg0: i32) -> (i32, i32) {
    %c0_i32 = arith.constant 0 : i32
    %c0_i32_0 = arith.constant 0 : i32
    %c0_i32_1 = arith.constant 0 : i32
    return %c0_i32, %c0_i32_0 : i32, i32
  }
  func.func @transform_4(%arg0: i32) -> (i32, i32) {
    %c0_i32 = arith.constant 0 : i32
    %c0_i32_0 = arith.constant 0 : i32
    %c0_i32_1 = arith.constant 0 : i32
    return %c0_i32, %c0_i32_0 : i32, i32
  }
  func.func @transform_5(%arg0: i32) -> (i32, i32) {
    %c0_i32 = arith.constant 0 : i32
    %c0_i32_0 = arith.constant 0 : i32
    %c0_i32_1 = arith.constant 0 : i32
    return %c0_i32, %c0_i32_0 : i32, i32
  }
  func.func @transform_6(%arg0: i32) -> (i32, i32) {
    %c0_i32 = arith.constant 0 : i32
    %c0_i32_0 = arith.constant 0 : i32
    %c0_i32_1 = arith.constant 0 : i32
    return %c0_i32, %c0_i32_0 : i32, i32
  }
  func.func @transform_7(%arg0: i32) -> (i32, i32) {
    %c0_i32 = arith.constant 0 : i32
    %c0_i32_0 = arith.constant 0 : i32
    %c0_i32_1 = arith.constant 0 : i32
    return %c0_i32, %c0_i32_0 : i32, i32
  }
  func.func @transform_8(%arg0: i32) -> (i32, i32, i32) {
    %c0_i32 = arith.constant 0 : i32
    %c0_i32_0 = arith.constant 0 : i32
    %c0_i32_1 = arith.constant 0 : i32
    return %arg0, %c0_i32, %c0_i32_0 : i32, i32, i32
  }
  func.func @transform_9(%arg0: i32) -> (i32, i32, i32) {
    %c0_i32 = arith.constant 0 : i32
    %c0_i32_0 = arith.constant 0 : i32
    %c0_i32_1 = arith.constant 0 : i32
    return %arg0, %c0_i32, %c0_i32_0 : i32, i32, i32
  }
}

</mosaic_0001>

<bundles_post_ra>
// kernel: tpu_custom_call.1
= control target key start
LH: loop header
LB: loop body
LE: loop exit
PB: predicated region body
PF: predicated region fallthrough
CT: control target
= control target key end

     0   :  { %s2618_s0 = inlined_call_operand.vmem [shape: f32[4,1,20], index: 0, kind: input, shape index: {}]   ;;  %s2619_s1 = inlined_call_operand.vmem [shape: f32[8,3], index: 1, kind: input, shape index: {}]   ;;  %s2620_s2 = inlined_call_operand.vmem [shape: f32[8,1], index: 2, kind: input, shape index: {}]   ;;  %s2621_s3 = inlined_call_operand.vmem [shape: f32[16,24], index: 3, kind: input, shape index: {}]   ;;  %s2622_s4 = inlined_call_operand.vmem [shape: f32[16,1], index: 4, kind: input, shape index: {}]   ;;  %s2623_s5 = inlined_call_operand.vmem [shape: bf16[22,178], index: 5, kind: input, shape index: {}]   ;;  %s2624_s6 = inlined_call_operand.vmem [shape: bf16[178,16], index: 6, kind: input, shape index: {}]   ;;  %s2625_s7 = inlined_call_operand.vmem [shape: f32[2,32], index: 7, kind: input, shape index: {}]   ;;  %s2626_s8 = inlined_call_operand.vmem [shape: bf16[4,178,178], index: 8, kind: output, shape index: {0}]   ;;  %s2627_s9 = inlined_call_operand.hbm [shape: f32[2,2,178], index: 9, kind: output, shape index: {1}]  }
   0x1   :  { %2629 = sst [smem:[#allocation7_spill]] %s2619_s1 }
   0x2   :  { %15 = vsyncpa [#allocation5], 0 }
   0x3   :  { %17 = vsyncpa [#allocation5 + $0x1], 0  ;;  %s2161_s30 = smov 0   ;;  %s2163_s10 = smov 0  }
   0x4   :  { %s2165_s11 = smov 0   ;;  %s2167_s12 = smov 0  }
   0x5 LB: > { %s2182_s13 = sadd.s32 4294967295, %s2089_s12   ;;  %s1763_s14 = sadd.s32 4294967294, %s2089_s12   ;;  %s2089_s12 = sphi %s2167_s12, %s2641_s12   ;;  %s2085_s11 = sphi %s2165_s11, %s2640_s11   ;;  %s2081_s10 = sphi %s2163_s10, %s2639_s10   ;;  %s2077_s30 = sphi %s2161_s30, %s2638_s30  }
   0x6   : > { %s2186_s15 = sadd.s32 1, %s2089_s12   ;;  %s229_s16 = sadd.s32 1, %s2085_s11 }
   0x7   : > { %s226_s17 = ssub.s32 %s2089_s12, %s2186_s15  ;;  %p239_p0 = scmp.ne.s32.totalorder %s2085_s11, %s2081_s10 }
   0x8   : > { %p227_p1 = scmp.eq.s32.totalorder %s226_s17, 0  ;;  %p240_p2 = scmp.eq.s32.totalorder %s2182_s13, 1 }
   0x9   : > { %p245_p3 = scmp.ne.s32.totalorder %s2081_s10, %s2077_s30  ;;  %p246_p4 = scmp.eq.s32.totalorder %s1763_s14, 1 }
   0xa   : > { %s2197_s18 = scalar_select %p227_p1, %s2085_s11, %s229_s16  }
   0xb   : > { %p2199_p5 = por %p240_p2, %p239_p0  ;;  %p2203_p6 = por %p246_p4, %p245_p3 }
   0xc   : > { %p1766_p7 = scmp.ge.s32.totalorder %s2089_s12, 1  ;;  %p293_p8 = scmp.lt.s32.totalorder %s2089_s12, 3 }
   0xe   : > { %p294_p9 = pnand %p1766_p7, %p293_p8 }
   0xf   : > { %s2628_s21 = sand.u32 (!%p294_p9), 1, %s2081_s10   ;;  %s1768_s22 = sshll.u32 (!%p294_p9), %s2182_s13, 1  ;;  %v2219_v1 = vld [vmem:[%s2620_s2] sm:$0xff] (!%p294_p9)  ;;  %v2233_v3 = vld [vmem:[%s2621_s3 + $0x8] sm:$0xff] (!%p294_p9) }
  0x10   : > { %297 = sbr.rel (%p294_p9) target bundleno = 1630 (0x65e), region = 52  ;;  %s2632_s1 = sld [smem:[#allocation7_spill]] (!%p294_p9)  ;;  %v2224_v2 = vld [vmem:[%s2621_s3] sm:$0xff] (!%p294_p9)  ;;  %v2243_v5 = vld [vmem:[%s2622_s4 + $0x8] sm:$0xff] (!%p294_p9) }
  0x11   : > { %s2228_s29 = sshll.u32 (!%p294_p9), %s2628_s21, 2  ;;  %p335_p10 = scmp.lt.s32.totalorder (!%p294_p9), %s1768_s22, 3  ;;  %v2238_v4 = vld [vmem:[%s2622_s4] sm:$0xff] (!%p294_p9) }
  0x16   : > { %v2214_v0 = vld [vmem:[%s2632_s1] sm:$0xff] (!%p294_p9)  ;;  %s2258_s1 = smov (!%p294_p9), 0  }
  0x17   : > { %s2643_s22 = smov (!%p335_p10, %s1768_s22), 3 }
  0x18   : > { %s337_s28 = scalar_lea.vmem %s2618_s0, %s2643_s22  ;;  %s1943_s14 = smul.u32 184, %s2643_s22 }
  0x1a   : > { %s2255_s17 = scalar_lea.vmem %s2626_s8, %s1943_s14 }
  0x1b LB: >> { %v2099_v6 = vmov 1   ;;  %v2100_v7 = vmov 0   ;;  %v2101_v8 = vmov 2   ;;  %s359_s25 = scalar_lea.vmem %s337_s28, %s2093_s1  ;;  %s2102_s26 = smov 127   ;;  %vm404_vm0 = vcmask 31744   ;;  %s2093_s1 = sphi %s2258_s1, %s358_s1  }
  0x1c   : >> { %2010 = vset.pattern.permute.xlu0 %v2099_v6  ;;  %2012 = vset.pattern.permute.xlu1 %v2100_v7  ;;  %v1771_v9 = vld [vmem:[%s359_s25] ss:$0 sm:$0xff]  ;;  %s2103_s27 = smov 126   ;;  %s2104_s14 = smov 4   ;;  %vm406_vm1 = vcmask 179200   ;;  %vm420_vm2 = vcmask 195584  }
  0x1d   : >> { %380 = vperm.xlu0 %2010, %v2214_v0   ;;  %363 = vperm.xlu1 %2012, %v2214_v0   ;;  %s2105_s16 = smov 124   ;;  %s1774_s21 = sshll.u32 %s2093_s1, 4 }
  0x1e   : >> { %1876 = vmatprep.mubr.msk.f32.mxu0 %vm420_vm2, %v2224_v2  ;;  %s516_s24 = sshra.s32 %s1774_s21, 4  ;;  %s358_s1 = sadd.s32 1, %s2093_s1  }
  0x1f   : >> { %s1775_s25 = sshll.u32 %s516_s24, 3  ;;  %p355_p11 = scmp.ge.s32.totalorder %s358_s1, 2  }
  0x20   : > { %v2014_v38 = vld [vmem:[%s2623_s5 + $0x4] ss:$8 sps:$4 sm:$0xff] (%p355_p11)   ;;  %v2016_v39 = vld [vmem:[%s2623_s5] ss:$8 sps:$4 sm:$0xff] (%p355_p11)   ;;  %v525_v40 = vld [vmem:[%s2623_s5 + $0x10] sm:$0x77] (%p355_p11) }
  0x21   : >> { %2011 = vset.pattern.permute.xlu0 %v2101_v8  ;;  %375 = vperm.xlu1 %2012, %v2219_v1   ;;  %vm548_vm3 = vcmask (%p355_p11), 1042432   ;;  %v2106_v41 = vmov (%p355_p11), 0   ;;  %v1779_v42 = vcombine.high (%p355_p11), %v525_v40, %v525_v40  ;;  %v1778_v43 = vcombine.low (%p355_p11), %v525_v40, %v525_v40  ;;  %v617_v48 = vld [vmem:[%s2625_s7] sm:$0x3] (%p355_p11) }
  0x22   : >> { %390 = vperm.xlu0 %2011, %v2214_v0   ;;  %v2107_v47 = vmov (%p355_p11), 0.0   ;;  %vm618_vm4 = vcmask (%p355_p11), 261120   ;;  %vm609_vm5 = vcmask (%p355_p11), 408576   ;;  %vm1176_vm6 = vcmask (%p355_p11), 1041408  }
  0x23   : > { %v550_v44 = vsel (%p355_p11), %vm548_vm3, %v1778_v43, 0  ;;  %898 = vmatprep.mubr.f32.mxu1 (%p355_p11), %v2107_v47  ;;  %v620_v49 = vsel (%p355_p11), %vm618_vm4, %v617_v48, 0  ;;  %vm1177_vm7 = vcmask (%p355_p11), 404482  }
  0x24   : > { %v2301_v50 = vand.u32 (%p355_p11), 4294901760, %v620_v49  ;;  %vm1178_vm8 = vmor (%p355_p11), %vm1177_vm7, %vm1176_vm6 }
  0x26   : >> { %2013 = vset.pattern.permute.xlu0 %v2100_v7  ;;  %v2305_v56 = vsub.f32 (%p355_p11), %v620_v49, %v2301_v50 }
  0x9c   : >> { %v381_v10 = vpop.permute.xlu0 %380  ;;  %v364_v14 = vpop.permute.xlu1 %363 }
  0x9d   : >> { %v383_v11 = vmul.f32 %v1771_v9, %v381_v10  ;;  %v372_v16 = vmul.f32 %v1771_v9, %v364_v14 }
  0x9f   : >> { %385 = vrot.lane.b32.xlu1 %v383_v11, %s2102_s26 }
  0xa0   : >> { %v376_v15 = vpop.permute.xlu1 %375 }
  0xa1   : >> { %v391_v12 = vpop.permute.xlu0 %390  ;;  %v378_v18 = vadd.f32 %v376_v15, %v372_v16 }
  0xa2   : >> { %v393_v13 = vmul.f32 %v1771_v9, %v391_v12 }
  0xa4   : >> { %395 = vrot.lane.b32.xlu0 %v393_v13, %s2103_s27 }
 0x111   : >> { %v386_v17 = vpop.permute.xlu1 %385 }
 0x112   : >> { %v388_v19 = vadd.f32 %v386_v17, %v378_v18 }
 0x116   : >> { %v396_v20 = vpop.permute.xlu0 %395 }
 0x117   : >> { %v398_v21 = vadd.f32 %v396_v20, %v388_v19 }
 0x119   : >> { %v399_v22 = vmax.f32 %v398_v21, 0.0 }
 0x11b   : >> { %401 = vrot.lane.b32.xlu1 %v399_v22, %s2104_s14 }
 0x18d   : >> { %v402_v23 = vpop.permute.xlu1 %401 }
 0x18e   : >> { %v405_v24 = vsel %vm404_vm0, 0.0, %v402_v23 }
 0x18f   : >> { %v407_v25 = vsel %vm406_vm1, %v405_v24, 0.0 }
 0x190   : >> { %409 = vrot.lane.b32.xlu0 %v407_v25, %s2102_s26  ;;  %s519_s26 = scalar_lea.vmem [#allocation2], %s1775_s25  ;;  %s2633_s25 = scalar_lea.vmem (%p355_p11), [#allocation4], %s2228_s29 }
 0x202   : >> { %v410_v26 = vpop.permute.xlu0 %409 }
 0x203   : >> { %v412_v27 = vmax.f32 %v407_v25, %v410_v26 }
 0x205   : >> { %417 = vrot.lane.b32.xlu0 %v412_v27, %s2105_s16  ;;  %414 = vrot.lane.b32.xlu1 %v412_v27, %s2103_s27 }
 0x209   : >> { %504 = vperm.xlu1 %2012, %v2238_v4   ;;  %509 = vperm.xlu0 %2013, %v2243_v5   ;;  %v697_v4 = vand.u32 (%p355_p11), 4294901760, %v2305_v56 }
 0x20b   : > { %v698_v19 = vsub.f32 (%p355_p11), %v2305_v56, %v697_v4 }
 0x20d   : > { %v699_v43 = vand.u32 (%p355_p11), 4294901760, %v698_v19 }
 0x277   : >> { %v415_v28 = vpop.permute.xlu1 %414  ;;  %v418_v30 = vpop.permute.xlu0 %417 }
 0x278   : >> { %v1879_v29 = vpack.c.bf16 %v415_v28, %v412_v27 }
 0x27a   : >> { %1880 = vmatprep.subr.bf16.mxu0 %v1879_v29 }
 0x27b   : >> { %1882 = vmatpush3.bf16.msra.mxu0 %v1879_v29 }
 0x27c   : >> { %1874 = vmatprep.subr.mxu0 %v418_v30 }
 0x27f   : >> { %1875 = vmatpush3.msra.mxu0 %v418_v30 }
 0x280   : >> { %1877 = vmatmul.mubr.msk.f32.vlgmr.msra.gmra.mrb[0].mxu0 %vm420_vm2, %v2233_v3  ;;  %555 = vmatprep.subr.bf16.mxu0 (%p355_p11), %v2014_v38 }
 0x281   : > { %587 = vmatprep.mubr.bf16.mxu0 (%p355_p11), %v2106_v41  ;;  %556 = vmatpush1.bf16.msra.mxu0 (%p355_p11), %v2016_v39 }
 0x282   : > { %1780 = vmatprep.subr.msk.bf16.mxu0 (%p355_p11), %vm548_vm3, %v1779_v42 }
 0x285   : > { %558 = vmatpush1.bf16.msra.mxu0 (%p355_p11), %v550_v44 }
 0x288   : >> { %v510_v31 = vpop.permute.xlu0 %509  ;;  %v505_v33 = vpop.permute.xlu1 %504 }
 0x353   : >> { %v1878_v32 = vpop.f32.mrb[0].mxu0  ;;  %357 = sbr.rel (!%p355_p11) target bundleno = 27 (0x1b), region = 117 }
 0x354   : >> { %v513_v34 = vadd.f32 %v1878_v32, %v510_v31  ;;  %v493_v35 = vpop.f32.mrb[1].mxu0 }
 0x355   : >> { %v512_v36 = vadd.f32 %v505_v33, %v493_v35 }
 0x357   : >> { %v515_v37 = vpack.c.bf16 %v513_v34, %v512_v36 }
 0x359   : >> { %520 = vst.msk [vmem:[%s519_s26] sm:$0xff] %vm406_vm1, %v515_v37  ;;  %s2454_s26 = smov (%p355_p11), 0  }
 0x360   : > { %v521_v45 = vld [vmem:[#allocation2] sm:$0xff]  ;;  %v522_v46 = vld [vmem:[#allocation2 + $0x8] sm:$0xff] }
 0x361   : > { %1781 = vmatmul.mubr.msk.bf16.vlgmr.msra.gmra.mrb[0].mxu0 %vm406_vm1, %v521_v45 }
 0x362   : > { %597 = vmatprep.mubr.bf16.mxu0 %v2106_v41 }
 0x369   : > { %1782 = vmatmul.mubr.msk.bf16.gmra.mrb[4].mxu0 %vm406_vm1, %v522_v46 }
 0x36a   : > { %694 = vmatprep.mubr.f32.mxu0 %v2107_v47 }
 0x434   : > { %v589_v51 = vpop.f32.mrb[0].mxu0 }
 0x435   : > { %608 = vst [vmem:[#allocation3] sm:$0xff] %v589_v51  ;;  %v624_v52 = vand.u32 4294901760, %v589_v51  ;;  %v591_v53 = vpop.f32.mrb[1].mxu0 }
 0x436   : > { %610 = vst.msk [vmem:[#allocation3 + $0x8] sm:$0xff] %vm609_vm5, %v591_v53  ;;  %v622_v54 = vand.u32 4294901760, %v591_v53  ;;  %v593_v55 = vpop.f32.mrb[2].mxu0 }
 0x437   : > { %v713_v57 = vsub.f32 %v589_v51, %v624_v52  ;;  %611 = vst [vmem:[#allocation3 + $0x10] sm:$0xff] %v593_v55  ;;  %v628_v58 = vand.u32 4294901760, %v593_v55  ;;  %v595_v59 = vpop.f32.mrb[3].mxu0 }
 0x438   : > { %v707_v60 = vsub.f32 %v591_v53, %v622_v54  ;;  %612 = vst.msk [vmem:[#allocation3 + $0x18] sm:$0xff] %vm609_vm5, %v595_v59  ;;  %v626_v61 = vand.u32 4294901760, %v595_v59 }
 0x439   : > { %v714_v62 = vand.u32 4294901760, %v713_v57  ;;  %v2308_v63 = vpack.c.bf16 %v628_v58, %v624_v52  ;;  %v725_v0 = vsub.f32 %v593_v55, %v628_v58  ;;  %v2345_v58 = vld [vmem:[%s2624_s6 + $0x4] sm:$0xf] }
 0x43a   : > { %v708_v1 = vand.u32 4294901760, %v707_v60  ;;  %v719_v2 = vsub.f32 %v595_v59, %v626_v61  ;;  %v2310_v3 = vpack.c.bf16 %v626_v61, %v622_v54  ;;  %v2350_v59 = vld [vmem:[%s2624_s6 + $0x8] sm:$0xf]  ;;  %v2370_v61 = vld [vmem:[%s2624_s6 + $0x18] sm:$0xf] }
 0x43b   : > { %v715_v5 = vsub.f32 %v713_v57, %v714_v62  ;;  %v726_v6 = vand.u32 4294901760, %v725_v0  ;;  %v1901_v7 = vpack.c.bf16 %v725_v0, %v713_v57 }
 0x43c   : > { %v720_v8 = vand.u32 4294901760, %v719_v2  ;;  %v599_v9 = vpop.f32.mrb[4].mxu0  ;;  %1884 = vmatprep.subr.bf16.mxu0 %v2310_v3  ;;  %v1899_v10 = vpack.c.bf16 %v719_v2, %v707_v60  ;;  %v709_v11 = vsub.f32 %v707_v60, %v708_v1  ;;  %v2365_v60 = vld [vmem:[%s2624_s6 + $0x14] sm:$0xf] }
 0x43d   : > { %v727_v12 = vsub.f32 %v725_v0, %v726_v6  ;;  %613 = vst [vmem:[#allocation3 + $0x20] sm:$0xff] %v599_v9  ;;  %v632_v13 = vand.u32 4294901760, %v599_v9  ;;  %v601_v14 = vpop.f32.mrb[5].mxu0  ;;  %1886 = vmatpush1.bf16.msra.mxu0 %v2308_v63  ;;  %v2315_v15 = vpack.c.bf16 %v726_v6, %v714_v62  ;;  %v716_v21 = vand.u32 4294901760, %v715_v5  ;;  %v2375_v62 = vld [vmem:[%s2624_s6 + $0x1c] sm:$0xf] }
 0x43e   : > { %614 = vst.msk [vmem:[#allocation3 + $0x28] sm:$0xff] %vm609_vm5, %v601_v14  ;;  %v630_v16 = vand.u32 4294901760, %v601_v14  ;;  %v603_v17 = vpop.f32.mrb[6].mxu0  ;;  %1900 = vmatprep.subr.bf16.mxu1 %v1899_v10  ;;  %v721_v18 = vsub.f32 %v719_v2, %v720_v8  ;;  %v1915_v20 = vpack.c.bf16 %v720_v8, %v708_v1  ;;  %v710_v28 = vand.u32 4294901760, %v709_v11  ;;  %v2385_v0 = vld [vmem:[%s2624_s6 + $0x24] sm:$0xf] }
 0x43f   : > { %v728_v22 = vand.u32 4294901760, %v727_v12  ;;  %v737_v23 = vsub.f32 %v599_v9, %v632_v13  ;;  %615 = vst [vmem:[#allocation3 + $0x30] sm:$0xff] %v603_v17  ;;  %v636_v24 = vand.u32 4294901760, %v603_v17  ;;  %v605_v25 = vpop.f32.mrb[7].mxu0  ;;  %1902 = vmatpush1.bf16.msra.mxu1 %v1901_v7  ;;  %v2390_v1 = vld [vmem:[%s2624_s6 + $0x28] sm:$0xf] }
 0x440   : > { %v731_v26 = vsub.f32 %v601_v14, %v630_v16  ;;  %616 = vst.msk [vmem:[#allocation3 + $0x38] sm:$0xff] %vm609_vm5, %v605_v25  ;;  %v634_v27 = vand.u32 4294901760, %v605_v25  ;;  %v722_v29 = vand.u32 4294901760, %v721_v18  ;;  %v2395_v2 = vld [vmem:[%s2624_s6 + $0x2c] sm:$0xf]  ;;  %v1171_v18 = vlaneseq }
 0x441   : > { %v738_v30 = vand.u32 4294901760, %v737_v23  ;;  %v1889_v31 = vpack.c.bf16 %v636_v24, %v632_v13  ;;  %v749_v32 = vsub.f32 %v603_v17, %v636_v24  ;;  %v1893_v33 = vpack.c.bf16 %v728_v22, %v716_v21  ;;  %v2410_v5 = vld [vmem:[%s2624_s6 + $0x38] sm:$0xf]  ;;  %v2415_v6 = vld [vmem:[%s2624_s6 + $0x3c] sm:$0xf] }
 0x442   : > { %v732_v34 = vand.u32 4294901760, %v731_v26  ;;  %v743_v35 = vsub.f32 %v605_v25, %v634_v27  ;;  %v1887_v36 = vpack.c.bf16 %v634_v27, %v630_v16  ;;  %v1891_v37 = vpack.c.bf16 %v722_v29, %v710_v28  ;;  %v2420_v7 = vld [vmem:[%s2624_s6 + $0x40] sm:$0xf]  ;;  %v2425_v8 = vld [vmem:[%s2624_s6 + $0x44] sm:$0xf] }
 0x443   : > { %v739_v38 = vsub.f32 %v737_v23, %v738_v30  ;;  %v750_v39 = vand.u32 4294901760, %v749_v32  ;;  %v1905_v40 = vpack.c.bf16 %v749_v32, %v737_v23  ;;  %v2430_v9 = vld [vmem:[%s2624_s6 + $0x48] sm:$0xf]  ;;  %v2435_v10 = vld [vmem:[%s2624_s6 + $0x4c] sm:$0xf] }
 0x444   : > { %v744_v41 = vand.u32 4294901760, %v743_v35  ;;  %1888 = vmatprep.subr.bf16.mxu0 %v1887_v36  ;;  %v1903_v42 = vpack.c.bf16 %v743_v35, %v731_v26  ;;  %v733_v44 = vsub.f32 %v731_v26, %v732_v34  ;;  %v2440_v11 = vld [vmem:[%s2624_s6 + $0x50] sm:$0xf]  ;;  %v2445_v12 = vld [vmem:[%s2624_s6 + $0x54] sm:$0xf] }
 0x445   : > { %v751_v45 = vsub.f32 %v749_v32, %v750_v39  ;;  %1890 = vmatpush1.bf16.msra.mxu0 %v1889_v31  ;;  %v1921_v46 = vpack.c.bf16 %v750_v39, %v738_v30  ;;  %v740_v51 = vand.u32 4294901760, %v739_v38  ;;  %v2450_v13 = vld [vmem:[%s2624_s6 + $0x58] sm:$0x1]  ;;  %v2108_v16 = vmov 1983009808  }
 0x446   : > { %1892 = vmatprep.subr.bf16.mxu0 %v1891_v37  ;;  %1904 = vmatprep.subr.bf16.mxu1 %v1903_v42  ;;  %v745_v48 = vsub.f32 %v743_v35, %v744_v41  ;;  %v1919_v49 = vpack.c.bf16 %v744_v41, %v732_v34  ;;  %v734_v53 = vand.u32 4294901760, %v733_v44  ;;  %v1169_v17 = vunpack.c.l.s4 %v2108_v16 }
 0x447   : > { %v752_v52 = vand.u32 4294901760, %v751_v45  ;;  %1906 = vmatpush1.bf16.msra.mxu1 %v1905_v40 }
 0x448   : > { %1908 = vmatprep.subr.bf16.mxu1 %v2310_v3  ;;  %700 = vmatmul.mubr.f32.vlgmr.msra.gmra.mrb[8].mxu0 %v699_v43  ;;  %v746_v54 = vand.u32 4294901760, %v745_v48  ;;  %v1170_v19 = vunpack.c.0.s8 %v1169_v17 }
 0x449   : > { %1894 = vmatpush1.bf16.msra.mxu0 %v1893_v33  ;;  %v1897_v55 = vpack.c.bf16 %v752_v52, %v740_v51  ;;  %810 = vmatprep.mubr.f32.mxu0 %v2107_v47 }
 0x44a   : > { %901 = vmatmul.mubr.f32.vlgmr.msra.gmra.mrb[0].mxu1 %v2305_v56  ;;  %v1895_v57 = vpack.c.bf16 %v746_v54, %v734_v53  ;;  %v2340_v56 = vld [vmem:[%s2624_s6] sm:$0xf] }
 0x44b   : > { %1910 = vmatpush1.bf16.msra.mxu1 %v2308_v63  ;;  %979 = vmatprep.mubr.f32.mxu1 %v2107_v47 }
 0x44c   : > { %1896 = vmatprep.subr.bf16.mxu0 %v1895_v57  ;;  %1912 = vmatprep.subr.bf16.mxu1 %v1887_v36 }
 0x44d   : > { %1898 = vmatpush1.bf16.msra.mxu0 %v1897_v55 }
 0x44f   : > { %1914 = vmatpush1.bf16.msra.mxu1 %v1889_v31 }
 0x450   : > { %1916 = vmatprep.subr.bf16.mxu1 %v1915_v20  ;;  %812 = vmatmul.mubr.f32.vlgmr.msra.gmra.mrb[8].mxu0 %v2301_v50  ;;  %v1172_v20 = vshrl.u32 %v1171_v18, 7 }
 0x452   : > { %983 = vmatmul.mubr.f32.vlgmr.msra.gmra.mrb[0].mxu1 %v697_v4  ;;  %v2405_v4 = vld [vmem:[%s2624_s6 + $0x34] sm:$0xf]  ;;  %v1173_v25 = vsub.s32 %v1170_v19, %v1172_v20 }
 0x453   : > { %1918 = vmatpush1.bf16.msra.mxu1 %v2315_v15  ;;  %1077 = vmatprep.mubr.f32.mxu1 %v2107_v47 }
 0x454   : > { %1920 = vmatprep.subr.bf16.mxu1 %v1919_v49 }
 0x457   : > { %1922 = vmatpush1.bf16.msra.mxu1 %v1921_v46 }
 0x458   : > { %1924 = vmatprep.subr.bf16.mxu1 %v2310_v3  ;;  %v2400_v3 = vld [vmem:[%s2624_s6 + $0x30] sm:$0xf] }
 0x45a   : > { %1079 = vmatmul.mubr.f32.vlgmr.msra.gmra.mrb[0].mxu1 %v2301_v50 }
 0x45b   : > { %1926 = vmatpush1.bf16.msra.mxu1 %v2308_v63  ;;  %1157 = vmatprep.mubr.f32.mxu1 %v2107_v47  ;;  %v2355_v47 = vld [vmem:[%s2624_s6 + $0xc] sm:$0xf]  ;;  %v2380_v63 = vld [vmem:[%s2624_s6 + $0x20] sm:$0xf] }
 0x45c   : > { %1928 = vmatprep.subr.bf16.mxu1 %v1887_v36 }
 0x45f   : > { %1930 = vmatpush1.bf16.msra.mxu1 %v1889_v31 }
 0x462   : > { %1159 = vmatmul.mubr.f32.vlgmr.msra.gmra.mrb[0].mxu1 %v2301_v50  ;;  %v2360_v50 = vld [vmem:[%s2624_s6 + $0x10] sm:$0xf] }
 0x523   : > { %v813_v14 = vpop.f32.mrb[8].mxu0 }
 0x524   : > { %v815_v15 = vpop.f32.mrb[9].mxu0 }
 0x535   : > { %v1160_v21 = vpop.f32.mrb[0].mxu1 }
 0x536   : > { %v1931_v22 = vadd.f32 %v1160_v21, %v813_v14  ;;  %v1162_v23 = vpop.f32.mrb[1].mxu1 }
 0x537   : > { %v1932_v24 = vadd.f32 %v1162_v23, %v815_v15 }
 0x539   : > { %v1167_v26 = vcombine.low %v1931_v22, %v1932_v24 }
 0x53b   : > { %v1174_v27 = vrot.slane %v1167_v26, %v1173_v25 }
 0x53d   : > { %1179 = vst.msk [vmem:[%s2633_s25] sm:$0xf] %vm1178_vm8, %v1174_v27 }
 0x53e LB: >> { %v2109_v28 = vmov 0   ;;  %s1783_s27 = sshll.u32 %s2097_s26, 4  ;;  %v1786_v35 = vcombine.low %v2340_v56, %v2345_v58  ;;  %v1792_v36 = vcombine.low %v2400_v3, %v2405_v4  ;;  %vm1279_vm9 = vcmask 130048   ;;  %s1863_s24 = smul.u32 184, %s2097_s26  ;;  %s2097_s26 = sphi %s2454_s26, %s1208_s26  }
 0x53f   : >> { %1348 = vmatprep.mubr.bf16.mxu0 %v2109_v28  ;;  %1408 = vmatprep.mubr.bf16.mxu1 %v2109_v28  ;;  %s1210_s14 = sshra.s32 %s1783_s27, 3  ;;  %v1787_v37 = vcombine.low %v2350_v59, %v2355_v47  ;;  %v1793_v38 = vcombine.low %v2410_v5, %v2415_v6  ;;  %v1788_v39 = vcombine.low %v2360_v50, %v2365_v60  ;;  %vm1610_vm10 = vcmask 1043456   ;;  %s1208_s26 = sadd.s32 1, %s2097_s26  }
 0x540   : >> { %s1839_s16 = sshll.u32 %s1210_s14, 4  ;;  %v1794_v40 = vcombine.low %v2420_v7, %v2425_v8  ;;  %v1789_v41 = vcombine.low %v2370_v61, %v2375_v62  ;;  %v1795_v42 = vcombine.low %v2430_v9, %v2435_v10  ;;  %v1790_v43 = vcombine.low %v2380_v63, %v2385_v0  ;;  %s2498_s1 = scalar_lea.vmem %s2255_s17, %s1863_s24 }
 0x541   : >> { %s1214_s21 = scalar_lea.vmem [#allocation3], %s1839_s16  ;;  %v1796_v44 = vcombine.low %v2440_v11, %v2445_v12  ;;  %v1791_v45 = vcombine.low %v2390_v1, %v2395_v2  ;;  %v1797_v46 = vcombine.low %v2450_v13, %v2450_v13  ;;  %vm1611_vm11 = vcmask 408580   ;;  %p1205_p12 = scmp.ge.s32.totalorder %s1208_s26, 2  }
 0x542   : >> { %v1216_v29 = vld [vmem:[%s1214_s21 + $0x8] sm:$0xff]  ;;  %v1218_v30 = vld [vmem:[%s1214_s21 + $0x18] sm:$0xff]  ;;  %v1215_v31 = vld [vmem:[%s1214_s21] sm:$0xff]  ;;  %vm1635_vm13 = vcmask 1040384   ;;  %vm1636_vm14 = vcmask 405508   ;;  %s1864_s22 = sshll.u32 (%p1205_p12), %s2182_s13, 6 }
 0x543   : >> { %v1220_v32 = vpack.c.bf16 %v1218_v30, %v1216_v29  ;;  %v1217_v33 = vld [vmem:[%s1214_s21 + $0x10] sm:$0xff]  ;;  %vm2500_vm12 = vmor %vm1611_vm11, %vm1610_vm10  ;;  %s2578_s25 = scalar_lea.hbm (%p1205_p12), %s2627_s9, %s1864_s22  ;;  %s2636_s27 = scalar_lea.vmem (%p1205_p12), [#allocation4], %s2228_s29 }
 0x544   : >> { %v1219_v34 = vpack.c.bf16 %v1217_v33, %v1215_v31  ;;  %vm1637_vm15 = vmor %vm1636_vm14, %vm1635_vm13  ;;  %s1664_s14 = sshll.u32 (%p1205_p12), %s2636_s27, 4  ;;  %s2637_s16 = sand.u32 (%p1205_p12), 1, %s2081_s10   ;;  %s1665_s14 = int_to_ptr.vmem [resolvable:$true] %s1664_s14 }
 0x545   : >> { %1316 = vmatprep.subr.bf16.mxu0 %v1220_v32  ;;  %1941 = vmatprep.subr.bf16.mxu1 %v1220_v32  ;;  %s1646_s21 = scalar_lea.sflag (%p1205_p12), [#allocation5], %s2637_s16  ;;  %s2019_s24 = scalar_lea.vmem (%p1205_p12), %s1665_s14, 64 }
 0x546   : >> { %1317 = vmatpush1.bf16.msra.mxu0 %v1219_v34  ;;  %1942 = vmatpush1.bf16.msra.mxu1 %v1219_v34  ;;  %p2020_p13 = scmp.ne.s32.totalorder (%p1205_p12), %s1665_s14, %s2019_s24  ;;  %s2110_s17 = smov (%p1205_p12), [#allocation4]  }
 0x547   : > { %s2023_s26 = sshll.u32 (%p1205_p12), %s2110_s17, 4  ;;  %s2024_s26 = int_to_ptr.vmem [resolvable:$false] %s2023_s26 }
 0x548   : > { %p2021_p0 = pnand (%p1205_p12), %p2020_p13, %p2199_p5  ;;  %p2026_p2 = scmp.lt.s32.totalorder (%p1205_p12), %s1665_s14, %s2024_s26 }
 0x549   : >> { %1798 = vmatmul.mubr.msk.bf16.vlgmr.msra.gmra.mrb[0].mxu0 %vm1279_vm9, %v1786_v35  ;;  %1804 = vmatmul.mubr.msk.bf16.vlgmr.msra.gmra.mrb[0].mxu1 %vm1279_vm9, %v1792_v36 }
 0x54a   : >> { %1358 = vmatprep.mubr.bf16.mxu0 %v2109_v28  ;;  %1418 = vmatprep.mubr.bf16.mxu1 %v2109_v28  ;;  %p2022_p1 = pneg (%p1205_p12), %p2021_p0 }
 0x551   : >> { %1799 = vmatmul.mubr.msk.bf16.gmra.mrb[4].mxu0 %vm1279_vm9, %v1787_v37  ;;  %1805 = vmatmul.mubr.msk.bf16.gmra.mrb[4].mxu1 %vm1279_vm9, %v1793_v38 }
 0x552   : >> { %1368 = vmatprep.mubr.bf16.mxu0 %v2109_v28  ;;  %1428 = vmatprep.mubr.bf16.mxu1 %v2109_v28 }
 0x559   : >> { %1800 = vmatmul.mubr.msk.bf16.gmra.mrb[8].mxu0 %vm1279_vm9, %v1788_v39  ;;  %1806 = vmatmul.mubr.msk.bf16.gmra.mrb[8].mxu1 %vm1279_vm9, %v1794_v40 }
 0x55a   : >> { %1378 = vmatprep.mubr.bf16.mxu0 %v2109_v28  ;;  %1438 = vmatprep.mubr.bf16.mxu1 %v2109_v28 }
 0x561   : >> { %1801 = vmatmul.mubr.msk.bf16.gmra.mrb[12].mxu0 %vm1279_vm9, %v1789_v41  ;;  %1807 = vmatmul.mubr.msk.bf16.gmra.mrb[12].mxu1 %vm1279_vm9, %v1795_v42 }
 0x562   : >> { %1388 = vmatprep.mubr.bf16.mxu0 %v2109_v28  ;;  %1448 = vmatprep.mubr.bf16.mxu1 %v2109_v28 }
 0x569   : >> { %1802 = vmatmul.mubr.msk.bf16.gmra.mrb[16].mxu0 %vm1279_vm9, %v1790_v43  ;;  %1808 = vmatmul.mubr.msk.bf16.gmra.mrb[16].mxu1 %vm1279_vm9, %v1796_v44 }
 0x56a   : >> { %1398 = vmatprep.mubr.bf16.mxu0 %v2109_v28  ;;  %1458 = vmatprep.mubr.bf16.mxu1 %v2109_v28 }
 0x571   : >> { %1803 = vmatmul.mubr.msk.bf16.gmra.mrb[20].mxu0 %vm1279_vm9, %v1791_v45  ;;  %1809 = vmatmul.mubr.msk.bf16.gmra.mrb[20].mxu1 %vm1279_vm9, %v1797_v46 }
 0x61c   : >> { %v1350_v48 = vpop.f32.mrb[0].mxu0  ;;  %v1410_v49 = vpop.f32.mrb[0].mxu1 }
 0x61d   : >> { %v1352_v51 = vpop.f32.mrb[1].mxu0  ;;  %v1412_v53 = vpop.f32.mrb[1].mxu1 }
 0x61e   : >> { %v1840_v54 = vpack.c.bf16 %v1352_v51, %v1350_v48  ;;  %v1852_v55 = vpack.c.bf16 %v1412_v53, %v1410_v49  ;;  %v1354_v57 = vpop.f32.mrb[2].mxu0  ;;  %v1414_v14 = vpop.f32.mrb[2].mxu1 }
 0x61f   : >> { %v1356_v15 = vpop.f32.mrb[3].mxu0  ;;  %v1416_v16 = vpop.f32.mrb[3].mxu1 }
 0x620   : >> { %1613 = vst.msk [vmem:[%s2498_s1] sm:$0xff] %vm2500_vm12, %v1840_v54  ;;  %1625 = vst.msk [vmem:[%s2498_s1 + $0x60] sm:$0xff] %vm2500_vm12, %v1852_v55  ;;  %v1841_v17 = vpack.c.bf16 %v1356_v15, %v1354_v57  ;;  %v1853_v18 = vpack.c.bf16 %v1416_v16, %v1414_v14 }
 0x622   : >> { %1614 = vst.msk [vmem:[%s2498_s1 + $0x8] sm:$0xff] %vm2500_vm12, %v1841_v17  ;;  %1626 = vst.msk [vmem:[%s2498_s1 + $0x68] sm:$0xff] %vm2500_vm12, %v1853_v18 }
 0x624   : >> { %v1360_v19 = vpop.f32.mrb[4].mxu0  ;;  %v1420_v20 = vpop.f32.mrb[4].mxu1 }
 0x625   : >> { %v1362_v21 = vpop.f32.mrb[5].mxu0  ;;  %v1422_v22 = vpop.f32.mrb[5].mxu1 }
 0x626   : >> { %v1842_v23 = vpack.c.bf16 %v1362_v21, %v1360_v19  ;;  %v1854_v24 = vpack.c.bf16 %v1422_v22, %v1420_v20  ;;  %v1364_v25 = vpop.f32.mrb[6].mxu0  ;;  %v1424_v26 = vpop.f32.mrb[6].mxu1 }
 0x627   : >> { %v1366_v27 = vpop.f32.mrb[7].mxu0  ;;  %v1426_v28 = vpop.f32.mrb[7].mxu1 }
 0x628   : >> { %1615 = vst.msk [vmem:[%s2498_s1 + $0x10] sm:$0xff] %vm2500_vm12, %v1842_v23  ;;  %1627 = vst.msk [vmem:[%s2498_s1 + $0x70] sm:$0xff] %vm2500_vm12, %v1854_v24  ;;  %v1843_v29 = vpack.c.bf16 %v1366_v27, %v1364_v25  ;;  %v1855_v30 = vpack.c.bf16 %v1426_v28, %v1424_v26 }
 0x62a   : >> { %1616 = vst.msk [vmem:[%s2498_s1 + $0x18] sm:$0xff] %vm2500_vm12, %v1843_v29  ;;  %1628 = vst.msk [vmem:[%s2498_s1 + $0x78] sm:$0xff] %vm2500_vm12, %v1855_v30 }
 0x62c   : >> { %v1370_v31 = vpop.f32.mrb[8].mxu0  ;;  %v1430_v32 = vpop.f32.mrb[8].mxu1 }
 0x62d   : >> { %v1372_v33 = vpop.f32.mrb[9].mxu0  ;;  %v1432_v34 = vpop.f32.mrb[9].mxu1 }
 0x62e   : >> { %v1844_v35 = vpack.c.bf16 %v1372_v33, %v1370_v31  ;;  %v1856_v36 = vpack.c.bf16 %v1432_v34, %v1430_v32  ;;  %v1374_v37 = vpop.f32.mrb[10].mxu0  ;;  %v1434_v38 = vpop.f32.mrb[10].mxu1 }
 0x62f   : >> { %v1376_v39 = vpop.f32.mrb[11].mxu0  ;;  %v1436_v40 = vpop.f32.mrb[11].mxu1 }
 0x630   : >> { %1617 = vst.msk [vmem:[%s2498_s1 + $0x20] sm:$0xff] %vm2500_vm12, %v1844_v35  ;;  %1629 = vst.msk [vmem:[%s2498_s1 + $0x80] sm:$0xff] %vm2500_vm12, %v1856_v36  ;;  %v1845_v41 = vpack.c.bf16 %v1376_v39, %v1374_v37  ;;  %v1857_v42 = vpack.c.bf16 %v1436_v40, %v1434_v38 }
 0x632   : >> { %1618 = vst.msk [vmem:[%s2498_s1 + $0x28] sm:$0xff] %vm2500_vm12, %v1845_v41  ;;  %1630 = vst.msk [vmem:[%s2498_s1 + $0x88] sm:$0xff] %vm2500_vm12, %v1857_v42 }
 0x634   : >> { %v1380_v43 = vpop.f32.mrb[12].mxu0  ;;  %v1440_v44 = vpop.f32.mrb[12].mxu1 }
 0x635   : >> { %v1382_v45 = vpop.f32.mrb[13].mxu0  ;;  %v1442_v46 = vpop.f32.mrb[13].mxu1 }
 0x636   : >> { %v1846_v48 = vpack.c.bf16 %v1382_v45, %v1380_v43  ;;  %v1858_v49 = vpack.c.bf16 %v1442_v46, %v1440_v44  ;;  %v1384_v51 = vpop.f32.mrb[14].mxu0  ;;  %v1444_v53 = vpop.f32.mrb[14].mxu1 }
 0x637   : >> { %v1386_v54 = vpop.f32.mrb[15].mxu0  ;;  %v1446_v55 = vpop.f32.mrb[15].mxu1 }
 0x638   : >> { %1619 = vst.msk [vmem:[%s2498_s1 + $0x30] sm:$0xff] %vm2500_vm12, %v1846_v48  ;;  %1631 = vst.msk [vmem:[%s2498_s1 + $0x90] sm:$0xff] %vm2500_vm12, %v1858_v49  ;;  %v1847_v57 = vpack.c.bf16 %v1386_v54, %v1384_v51  ;;  %v1859_v14 = vpack.c.bf16 %v1446_v55, %v1444_v53 }
 0x63a   : >> { %1620 = vst.msk [vmem:[%s2498_s1 + $0x38] sm:$0xff] %vm2500_vm12, %v1847_v57  ;;  %1632 = vst.msk [vmem:[%s2498_s1 + $0x98] sm:$0xff] %vm2500_vm12, %v1859_v14 }
 0x63c   : >> { %v1390_v15 = vpop.f32.mrb[16].mxu0  ;;  %v1450_v16 = vpop.f32.mrb[16].mxu1 }
 0x63d   : >> { %v1392_v17 = vpop.f32.mrb[17].mxu0  ;;  %v1452_v18 = vpop.f32.mrb[17].mxu1 }
 0x63e   : >> { %v1848_v19 = vpack.c.bf16 %v1392_v17, %v1390_v15  ;;  %v1860_v20 = vpack.c.bf16 %v1452_v18, %v1450_v16  ;;  %v1394_v21 = vpop.f32.mrb[18].mxu0  ;;  %v1454_v22 = vpop.f32.mrb[18].mxu1 }
 0x63f   : >> { %v1396_v23 = vpop.f32.mrb[19].mxu0  ;;  %v1456_v24 = vpop.f32.mrb[19].mxu1 }
 0x640   : >> { %1621 = vst.msk [vmem:[%s2498_s1 + $0x40] sm:$0xff] %vm2500_vm12, %v1848_v19  ;;  %1633 = vst.msk [vmem:[%s2498_s1 + $0xa0] sm:$0xff] %vm2500_vm12, %v1860_v20  ;;  %v1849_v25 = vpack.c.bf16 %v1396_v23, %v1394_v21  ;;  %v1861_v26 = vpack.c.bf16 %v1456_v24, %v1454_v22 }
 0x642   : >> { %1622 = vst.msk [vmem:[%s2498_s1 + $0x48] sm:$0xff] %vm2500_vm12, %v1849_v25  ;;  %1634 = vst.msk [vmem:[%s2498_s1 + $0xa8] sm:$0xff] %vm2500_vm12, %v1861_v26 }
 0x644   : >> { %v1400_v27 = vpop.f32.mrb[20].mxu0  ;;  %v1460_v28 = vpop.f32.mrb[20].mxu1  ;;  %1207 = sbr.rel (!%p1205_p12) target bundleno = 1342 (0x53e), region = 128 }
 0x645   : >> { %v1402_v29 = vpop.f32.mrb[21].mxu0  ;;  %v1462_v30 = vpop.f32.mrb[21].mxu1 }
 0x646   : >> { %v1850_v31 = vpack.c.bf16 %v1402_v29, %v1400_v27  ;;  %v1862_v32 = vpack.c.bf16 %v1462_v30, %v1460_v28  ;;  %v1404_v33 = vpop.f32.mrb[22].mxu0  ;;  %v1464_v34 = vpop.f32.mrb[22].mxu1 }
 0x647   : >> { %v1406_v35 = vpop.f32.mrb[23].mxu0  ;;  %v1465_v36 = vpop.f32.mrb[23].mxu1 }
 0x648   : >> { %1623 = vst.msk [vmem:[%s2498_s1 + $0x50] sm:$0xff] %vm2500_vm12, %v1850_v31  ;;  %v1851_v37 = vpack.c.bf16 %v1406_v35, %v1404_v33 }
 0x649   : >> { %1638 = vst.msk [vmem:[%s2498_s1 + $0xb0] sm:$0x11] %vm1637_vm15, %v1862_v32 }
 0x64a   : >> { %1624 = vst.msk [vmem:[%s2498_s1 + $0x58] sm:$0xff] %vm2500_vm12, %v1851_v37  ;;  %s2025_s1 = scalar_lea.vmem (%p1205_p12), %s2024_s26, 128 }
 0x64b   : > { %p2027_p3 = scmp.lt.s32.totalorder %s2025_s1, %s2019_s24 }
 0x64d   : > { %p2028_p4 = por %p2027_p3, %p2026_p2 }
 0x64f   : > { %p2029_p7 = pnand %p2028_p4, %p2022_p1 }
 0x651   : > { %2032 = shalt.err (!%p2029_p7)
}
 0x652   : > { %s2033_s13 = scalar_lea.hbm %s2578_s25, 64  ;;  %s2037_s28 = scalar_lea.hbm %s2627_s9, 128 }
 0x653   : > { %p2034_p8 = scmp.ne.s32.totalorder %s2578_s25, %s2033_s13  ;;  %p2038_p11 = scmp.lt.u32.totalorder %s2578_s25, %s2627_s9 }
 0x654   : > { %p2039_p12 = scmp.lt.u32.totalorder %s2037_s28, %s2033_s13  ;;  %p2041_p0 = scmp.lt.u32.totalorder %s2033_s13, %s2578_s25 }
 0x655   : > { %p2035_p9 = pnand %p2034_p8, %p2199_p5 }
 0x656   : > { %p2040_p13 = por %p2039_p12, %p2038_p11 }
 0x657   : > { %p2036_p10 = pneg %p2035_p9 }
 0x658   : > { %p2042_p1 = por %p2041_p0, %p2040_p13 }
 0x65a   : > { %p2043_p2 = pnand %p2042_p1, %p2036_p10 }
 0x65c   : > { %2046 = shalt.err (!%p2043_p2)
}
 0x65d   : > { %1944 = dma.vmem_to_hbm [thread:$0]  (%p2199_p5), %s1665_s14, 64, %s2578_s25, %s1646_s21  }
 0x65e PF: > { %p1950_p3 = scmp.ge.s32.totalorder %s2089_s12, 2  ;;  %s1685_s16 = sand.u32 1, %s2077_s30  }
 0x65f   : > { %s1686_s24 = scalar_lea.sflag [#allocation5], %s1685_s16 }
 0x660   : > { %p1947_p4 = pnand %p1950_p3, %p2203_p6 }
 0x662   : > { %2072 = dma.done.wait (!%p1947_p4), %s1686_s24, 64  }
 0x663   : > { %2074 = vsyncadd (!%p1947_p4), %s1686_s24, 4294967232  ;;  %p20_p7 = scmp.ge.s32.totalorder %s2186_s15, 4   ;;  %s2638_s30 = smov %s2081_s10 }
 0x664   : > { %s2639_s10 = smov %s2085_s11  ;;  %s2640_s11 = smov %s2197_s18 }
 0x665   : > { %s2641_s12 = smov %s2186_s15  ;;  %22 = sbr.rel (!%p20_p7) target bundleno = 5 (0x5), region = 139 }
 0x66c   :  { %1691 = vsyncpa [#allocation5], 1 }
 0x66d   :  { %1693 = vsyncpa [#allocation5 + $0x1], 1 }

</bundles_post_ra>
